<compile_context>
chip_gen: v5e
topology: v5e:2x2
jax: 0.10.0
libtpu: 0.0.40
codegen_flags: <defaults>
</compile_context>

<pallas_src>
import functools

import jax
import jax.numpy as jnp
from jax.experimental import pallas as pl
from jax.experimental.pallas import tpu as pltpu


# ---------------------------------------------------------------------------
# Fused Pallas kernel: both classifiers + concat + permute, one batch row/step
# ---------------------------------------------------------------------------

def _blue_ocr_kernel(x_ref, w_ref, b_ref, o_ref, *, C, T3, n_cls):
    """x_ref: (1, 1, W*C)  lane-dense row, x_flat[w*C + c] = x[n, c, 0, w]
       w_ref: (6*C, 2*n_cls) = [W1_flat | W3_flat], W_flat[k*C+c, o] = w[o, c, 0, k]
       b_ref: (1, 2*n_cls)   = [b1 | b3]
       o_ref: (1, 1+T3, n_cls)
    """
    x = x_ref[0]                                                 # (1, W*C)

    # classifier3 input is x[:, :, :, 4:] zero-padded by one column each side.
    # Done in VMEM -- no host-side jnp.pad / extra HBM pass.
    zcol = jnp.zeros((1, C), jnp.float32)
    x3p = jnp.concatenate([zcol, x[:, 4 * C:], zcol], axis=1)    # (1, (W-2)*C)

    # im2col: window 0 = classifier1 patch (cols 0..5); windows 1..T3 =
    # classifier3 patches (stride 4 over the padded strip).  All slices are
    # static and contiguous in the lane-dense layout.
    patches = [x[:, :6 * C]]
    for t in range(T3):
        patches.append(x3p[:, 4 * t * C:(4 * t + 6) * C])
    P = jnp.concatenate(patches, axis=0)                         # (1+T3, 6*C)

    # One MXU matmul against both weight sets, biases folded into the epilogue.
    r = jnp.dot(P, w_ref[...], preferred_element_type=jnp.float32) + b_ref[...]

    # Row 0 takes classifier1 columns, rows 1.. take classifier3 columns.
    t_idx = jax.lax.broadcasted_iota(jnp.int32, (1 + T3, 1), 0)
    o_ref[0] = jnp.where(t_idx == 0, r[:, :n_cls], r[:, n_cls:2 * n_cls])


# ---------------------------------------------------------------------------
# Wrapper (host-side layout plumbing + pallas_call)
# ---------------------------------------------------------------------------

def blue_ocr_forward(x_nchw, w1, b1, w3, b3):
    """Pallas forward of Blue_ocr.  x_nchw: (N, C, 1, W) float32 (PyTorch layout)."""
    N, C, H, W = x_nchw.shape
    assert H == 1, "Blue_ocr's squeeze(2)/permute require a height-1 feature strip"
    assert W >= 8, "need >= 8 columns for the strided classifier3 branch"
    n_cls = w1.shape[0]
    T3 = (W - 8) // 4 + 1          # classifier3 output width
    T = 1 + T3

    # NCHW -> lane-dense (N, 1, W*C), width-major / channel-minor.
    x_flat = jnp.transpose(x_nchw[:, :, 0, :], (0, 2, 1)).reshape(N, 1, W * C)

    def flat_w(w):                 # (O, C, 1, 6) -> (6*C, O): [k*C+c, o] = w[o, c, 0, k]
        return jnp.transpose(w[:, :, 0, :], (2, 1, 0)).reshape(6 * C, n_cls)

    w_comb = jnp.concatenate([flat_w(w1), flat_w(w3)], axis=1)   # (6*C, 2*n_cls)
    b_comb = jnp.concatenate([b1, b3])[None, :]                  # (1, 2*n_cls)

    kernel = functools.partial(_blue_ocr_kernel, C=C, T3=T3, n_cls=n_cls)
    return pl.pallas_call(
        kernel,
        out_shape=jax.ShapeDtypeStruct((N, T, n_cls), jnp.float32),
        grid=(N,),
        in_specs=[
            pl.BlockSpec((1, 1, W * C), lambda n: (n, 0, 0)),
            pl.BlockSpec((6 * C, 2 * n_cls), lambda n: (0, 0)),
            pl.BlockSpec((1, 2 * n_cls), lambda n: (0, 0)),
        ],
        out_specs=pl.BlockSpec((1, T, n_cls), lambda n: (n, 0, 0)),
        compiler_params=pltpu.CompilerParams(
            dimension_semantics=("parallel",)),
    )(x_flat, w_comb, b_comb)


# ---------------------------------------------------------------------------
# Pure-JAX reference (literal translation of the PyTorch forward)
# ---------------------------------------------------------------------------

def ref_blue_ocr(x, w1, b1, w3, b3):
    dn = ("NCHW", "OIHW", "NCHW")
    hp = jax.lax.Precision.HIGHEST
    x1 = x[:, :, :, :6]
    x3 = x[:, :, :, 4:]
    out1 = jax.lax.conv_general_dilated(
        x1, w1, window_strides=(1, 1), padding=[(0, 0), (0, 0)],
        dimension_numbers=dn, precision=hp) + b1[None, :, None, None]
    out3 = jax.lax.conv_general_dilated(
        x3, w3, window_strides=(1, 4), padding=[(0, 0), (1, 1)],
        dimension_numbers=dn, precision=hp) + b3[None, :, None, None]
    out = jnp.concatenate([out1, out3], axis=-1)     # (N, 35, 1, 1+T3)
    out = out[:, :, 0, :]                            # squeeze(2)  (H == 1)
    return jnp.transpose(out, (0, 2, 1))             # (N, 1+T3, 35)


if __name__ == "__main__":
    key = jax.random.PRNGKey(0)
    kx, k1, k2, k3, k4 = jax.random.split(key, 5)

    # Small OCR-head config: batch 2, 32 feature channels, height-1 strip, width 32.
    N, C, H, W = 2, 32, 1, 32
    n_cls = 35

    x = jax.random.normal(kx, (N, C, H, W), jnp.float32)          # PyTorch NCHW
    w1 = 0.1 * jax.random.normal(k1, (n_cls, C, 1, 6), jnp.float32)
    b1 = 0.1 * jax.random.normal(k2, (n_cls,), jnp.float32)
    w3 = 0.1 * jax.random.normal(k3, (n_cls, C, 1, 6), jnp.float32)
    b3 = 0.1 * jax.random.normal(k4, (n_cls,), jnp.float32)

    out = blue_ocr_forward(x, w1, b1, w3, b3)
    out = jax.block_until_ready(out)

    T3 = (W - 8) // 4 + 1
    assert out.shape == (N, 1 + T3, n_cls)

    ref = ref_blue_ocr(x, w1, b1, w3, b3)
    if not jnp.allclose(out, ref, atol=1e-3, rtol=1e-3):
        raise AssertionError("Pallas output does not match reference")

    print("KERNEL_OK")
</pallas_src>

<mosaic_0001>
module attributes {stable_mosaic.version = 11 : i64} {
  func.func @_blue_ocr_kernel(%arg0: i32, %arg1: memref<1x1x1024xf32, #tpu.memory_space<vmem>>, %arg2: memref<192x70xf32, #tpu.memory_space<vmem>>, %arg3: memref<1x70xf32, #tpu.memory_space<vmem>>, %arg4: memref<1x8x35xf32, #tpu.memory_space<vmem>>) attributes {dimension_semantics = [#tpu.dimension_semantics<parallel>], iteration_bounds = array<i64: 2>, scalar_prefetch = 0 : i64, scratch_operands = 0 : i64, tpu.core_type = #tpu.core_type<tc>, window_params = [{transform_indices = @transform_0, window_bounds = array<i64: 1, 1, 1024>}, {pipeline_mode = #tpu.pipeline_mode<synchronous>, transform_indices = @transform_1, window_bounds = array<i64: 192, 70>}, {pipeline_mode = #tpu.pipeline_mode<synchronous>, transform_indices = @transform_2, window_bounds = array<i64: 1, 70>}, {transform_indices = @transform_3, window_bounds = array<i64: 1, 8, 35>}]} {
    %c0 = arith.constant 0 : index
    %c0_0 = arith.constant 0 : index
    %c0_1 = arith.constant 0 : index
    %0 = vector.load %arg1[%c0, %c0_0, %c0_1] : memref<1x1x1024xf32, #tpu.memory_space<vmem>>, vector<1x1x1024xf32>
    %1 = vector.shape_cast %0 : vector<1x1x1024xf32> to vector<1x1024xf32>
    %cst = arith.constant 0.000000e+00 : f32
    %2 = vector.broadcast %cst : f32 to vector<1x32xf32>
    %3 = vector.extract_strided_slice %1 {offsets = [0, 128], sizes = [1, 896], strides = [1, 1]} : vector<1x1024xf32> to vector<1x896xf32>
    %4 = tpu.concatenate %2, %3, %2 in 1 : vector<1x32xf32>, vector<1x896xf32>, vector<1x32xf32> -> vector<1x960xf32>
    %5 = vector.extract_strided_slice %1 {offsets = [0, 0], sizes = [1, 192], strides = [1, 1]} : vector<1x1024xf32> to vector<1x192xf32>
    %6 = vector.extract_strided_slice %4 {offsets = [0, 0], sizes = [1, 192], strides = [1, 1]} : vector<1x960xf32> to vector<1x192xf32>
    %7 = vector.extract_strided_slice %4 {offsets = [0, 128], sizes = [1, 192], strides = [1, 1]} : vector<1x960xf32> to vector<1x192xf32>
    %8 = vector.extract_strided_slice %4 {offsets = [0, 256], sizes = [1, 192], strides = [1, 1]} : vector<1x960xf32> to vector<1x192xf32>
    %9 = vector.extract_strided_slice %4 {offsets = [0, 384], sizes = [1, 192], strides = [1, 1]} : vector<1x960xf32> to vector<1x192xf32>
    %10 = vector.extract_strided_slice %4 {offsets = [0, 512], sizes = [1, 192], strides = [1, 1]} : vector<1x960xf32> to vector<1x192xf32>
    %11 = vector.extract_strided_slice %4 {offsets = [0, 640], sizes = [1, 192], strides = [1, 1]} : vector<1x960xf32> to vector<1x192xf32>
    %12 = vector.extract_strided_slice %4 {offsets = [0, 768], sizes = [1, 192], strides = [1, 1]} : vector<1x960xf32> to vector<1x192xf32>
    %13 = tpu.concatenate %5, %6, %7, %8, %9, %10, %11, %12 in 0 : vector<1x192xf32>, vector<1x192xf32>, vector<1x192xf32>, vector<1x192xf32>, vector<1x192xf32>, vector<1x192xf32>, vector<1x192xf32>, vector<1x192xf32> -> vector<8x192xf32>
    %c0_2 = arith.constant 0 : index
    %c0_3 = arith.constant 0 : index
    %14 = vector.load %arg2[%c0_2, %c0_3] : memref<192x70xf32, #tpu.memory_space<vmem>>, vector<192x70xf32>
    %cst_4 = arith.constant dense<0.000000e+00> : vector<8x70xf32>
    %15 = tpu.matmul %13, %14, %cst_4 {dimension_numbers = #tpu.dot_dimension_numbers<[1], [0], [0], [1], [0, 0, 1, 1], [], []>} : vector<8x192xf32>, vector<192x70xf32>, vector<8x70xf32> -> vector<8x70xf32>
    %c0_5 = arith.constant 0 : index
    %c0_6 = arith.constant 0 : index
    %16 = vector.load %arg3[%c0_5, %c0_6] : memref<1x70xf32, #tpu.memory_space<vmem>>, vector<1x70xf32>
    %17 = vector.broadcast %16 : vector<1x70xf32> to vector<8x70xf32>
    %18 = arith.addf %15, %17 : vector<8x70xf32>
    %19 = tpu.iota {dimensions = array<i32: 0>} : vector<8x1xi32>
    %c0_i32 = arith.constant 0 : i32
    %20 = vector.broadcast %c0_i32 : i32 to vector<8x1xi32>
    %21 = arith.cmpi eq, %19, %20 : vector<8x1xi32>
    %22 = vector.extract_strided_slice %18 {offsets = [0, 0], sizes = [8, 35], strides = [1, 1]} : vector<8x70xf32> to vector<8x35xf32>
    %23 = vector.extract_strided_slice %18 {offsets = [0, 35], sizes = [8, 35], strides = [1, 1]} : vector<8x70xf32> to vector<8x35xf32>
    %24 = vector.shape_cast %21 : vector<8x1xi1> to vector<8x1xi1>
    %25 = vector.broadcast %24 : vector<8x1xi1> to vector<8x35xi1>
    %26 = arith.select %25, %22, %23 : vector<8x35xi1>, vector<8x35xf32>
    %c0_7 = arith.constant 0 : index
    %c0_8 = arith.constant 0 : index
    %c0_9 = arith.constant 0 : index
    %27 = vector.load %arg4[%c0_7, %c0_8, %c0_9] : memref<1x8x35xf32, #tpu.memory_space<vmem>>, vector<1x8x35xf32>
    %28 = vector.shape_cast %27 : vector<1x8x35xf32> to vector<8x35xf32>
    %29 = vector.shape_cast %26 : vector<8x35xf32> to vector<1x8x35xf32>
    tpu.vector_store %arg4[%c0_7, %c0_8, %c0_9], %29 {strides = array<i32>} : memref<1x8x35xf32, #tpu.memory_space<vmem>>, vector<1x8x35xf32>,
    return
  }
  func.func @transform_0(%arg0: i32) -> (i32, i32, i32) {
    %c0_i32 = arith.constant 0 : i32
    %c0_i32_0 = arith.constant 0 : i32
    %c0_i32_1 = arith.constant 0 : i32
    return %arg0, %c0_i32, %c0_i32_0 : i32, i32, i32
  }
  func.func @transform_1(%arg0: i32) -> (i32, i32) {
    %c0_i32 = arith.constant 0 : i32
    %c0_i32_0 = arith.constant 0 : i32
    %c0_i32_1 = arith.constant 0 : i32
    return %c0_i32, %c0_i32_0 : i32, i32
  }
  func.func @transform_2(%arg0: i32) -> (i32, i32) {
    %c0_i32 = arith.constant 0 : i32
    %c0_i32_0 = arith.constant 0 : i32
    %c0_i32_1 = arith.constant 0 : i32
    return %c0_i32, %c0_i32_0 : i32, i32
  }
  func.func @transform_3(%arg0: i32) -> (i32, i32, i32) {
    %c0_i32 = arith.constant 0 : i32
    %c0_i32_0 = arith.constant 0 : i32
    %c0_i32_1 = arith.constant 0 : i32
    return %arg0, %c0_i32, %c0_i32_0 : i32, i32, i32
  }
}

</mosaic_0001>

<bundles_post_ra>
// kernel: tpu_custom_call.1
= control target key start
LH: loop header
LB: loop body
LE: loop exit
PB: predicated region body
PF: predicated region fallthrough
CT: control target
= control target key end

     0   :  { %8 = vsyncpa [#allocation3], 0  ;;  %s744_s0 = inlined_call_operand.vmem [shape: f32[2,1,1024], index: 0, kind: input, shape index: {}]   ;;  %s745_s1 = inlined_call_operand.vmem [shape: f32[192,70], index: 1, kind: input, shape index: {}]   ;;  %s746_s2 = inlined_call_operand.vmem [shape: f32[1,70], index: 2, kind: input, shape index: {}]   ;;  %s747_s3 = inlined_call_operand.hbm [shape: f32[2,8,35], index: 3, kind: output, shape index: {}]  }
   0x1   :  { %10 = vsyncpa [#allocation3 + $0x1], 0  ;;  %s552_s12 = smov 0   ;;  %s554_s13 = smov 0  }
   0x2   :  { %s556_s14 = smov 0   ;;  %s558_s15 = smov 0  }
   0x3 LB: > { %s573_s16 = sadd.s32 4294967295, %s528_s15   ;;  %s413_s17 = sadd.s32 4294967294, %s528_s15   ;;  %s528_s15 = sphi %s558_s15, %s753_s15   ;;  %s524_s14 = sphi %s556_s14, %s752_s14   ;;  %s520_s13 = sphi %s554_s13, %s751_s13   ;;  %s516_s12 = sphi %s552_s12, %s750_s12  }
   0x4   : > { %s577_s18 = sadd.s32 1, %s528_s15   ;;  %s91_s19 = sadd.s32 1, %s524_s14 }
   0x5   : > { %s88_s20 = ssub.s32 %s528_s15, %s577_s18  ;;  %p101_p0 = scmp.ne.s32.totalorder %s524_s14, %s520_s13 }
   0x6   : > { %p89_p1 = scmp.eq.s32.totalorder %s88_s20, 0  ;;  %p102_p2 = scmp.eq.s32.totalorder %s573_s16, 1 }
   0x7   : > { %p107_p3 = scmp.ne.s32.totalorder %s520_s13, %s516_s12  ;;  %p108_p4 = scmp.eq.s32.totalorder %s413_s17, 1 }
   0x8   : > { %s588_s21 = scalar_select %p89_p1, %s524_s14, %s91_s19  }
   0x9   : > { %p590_p5 = por %p102_p2, %p101_p0  ;;  %p594_p6 = por %p108_p4, %p107_p3 }
   0xa   : > { %p416_p7 = scmp.ge.s32.totalorder %s528_s15, 1  ;;  %p139_p8 = scmp.lt.s32.totalorder %s528_s15, 3 }
   0xc   : > { %p140_p9 = pnand %p416_p7, %p139_p8 }
   0xd   : > { %p162_p10 = scmp.lt.s32.totalorder (!%p140_p9), %s573_s16, 1  ;;  %s530_s17 = smov (!%p140_p9), 32  }
   0xe   : > { %143 = sbr.rel (%p140_p9) target bundleno = 411 (0x19b), region = 32  ;;  %s531_s26 = smov (!%p140_p9), 93  }
   0xf   : > { %s159_s27 = sand.u32 (!%p140_p9), 1, %s520_s13   ;;  %s421_s29 = sshll.u32 (!%p140_p9), %s573_s16, 3 }
  0x10   : > { %s349_s5 = scalar_lea.hbm (!%p140_p9), %s747_s3, %s421_s29  ;;  %s486_s19 = scalar_lea.hbm (!%p140_p9), %s747_s3, 16 }
  0x11   : > { %s353_s8 = sshll.u32 (!%p140_p9), %s349_s5, 4  ;;  %s354_s8 = int_to_ptr.hbm [resolvable:$true] %s353_s8 }
  0x12   : > { %s480_s10 = sshra.s32 (!%p140_p9), %s354_s8, 4  ;;  %s481_s10 = int_to_ptr.hbm [resolvable:$true] %s480_s10 }
  0x13   : > { %v269_v0 = vld [vmem:[%s745_s1 + $0x78] sm:$0xff]  ;;  %v268_v1 = vld [vmem:[%s745_s1 + $0x70] sm:$0xff]  ;;  %s163_s28 = scalar_select %p162_p10, %s573_s16, 1  ;;  %v267_v2 = vld [vmem:[%s745_s1 + $0x68] sm:$0xff]  ;;  %vm189_vm0 = vcmask 261120   ;;  %vm233_vm1 = vcmask 1040384  }
  0x14   : > { %286 = vmatpush.msra.mxu0 %v269_v0  ;;  %v266_v3 = vld [vmem:[%s745_s1 + $0x60] sm:$0xff]  ;;  %v265_v7 = vld [vmem:[%s745_s1 + $0x58] sm:$0xff]  ;;  %v264_v13 = vld [vmem:[%s745_s1 + $0x50] sm:$0xff]  ;;  %vm236_vm2 = vcmask 1041408   ;;  %vm239_vm3 = vcmask 1042432   ;;  %vm242_vm4 = vcmask 1043456   ;;  %p487_p0 = scmp.lt.s32.totalorder %s481_s10, %s747_s3 }
  0x15   : > { %s418_s4 = sshll.u32 %s163_s28, 3  ;;  %v263_v14 = vld [vmem:[%s745_s1 + $0x48] sm:$0xff]  ;;  %v262_v15 = vld [vmem:[%s745_s1 + $0x40] sm:$0xff]  ;;  %v261_v16 = vld [vmem:[%s745_s1 + $0x38] sm:$0xff]  ;;  %vm245_vm5 = vcmask 1044480   ;;  %vm248_vm6 = vcmask 1045504  }
  0x16   : > { %287 = vmatpush.msra.mxu0 %v268_v1  ;;  %s165_s9 = scalar_lea.vmem %s744_s0, %s418_s4  ;;  %v277_v17 = vld [vmem:[%s745_s1 + $0xb8] sm:$0xff]  ;;  %v260_v18 = vld [vmem:[%s745_s1 + $0x30] sm:$0xff]  ;;  %v259_v20 = vld [vmem:[%s745_s1 + $0x28] sm:$0xff]  ;;  %vm251_vm7 = vcmask 1046528   ;;  %vm282_vm8 = vcmask 523264   ;;  %s417_s28 = sshll.u32 %s159_s27, 3 }
  0x17   : > { %v617_v4 = vld [vmem:[%s165_s9] sm:$0xff]  ;;  %314 = vmatpush.msra.mxu1 %v277_v17  ;;  %v276_v19 = vld [vmem:[%s745_s1 + $0xb0] sm:$0xff]  ;;  %v275_v21 = vld [vmem:[%s745_s1 + $0xa8] sm:$0xff]  ;;  %v326_v17 = vlaneseq  ;;  %s161_s6 = scalar_lea.vmem [#allocation2], %s417_s28  ;;  %vm336_vm10 = vcmask 285696   ;;  %s339_s9 = scalar_lea.sflag [#allocation3], %s159_s27 }
  0x18   : > { %288 = vmatpush.msra.mxu0 %v267_v2  ;;  %v170_v5 = vperm.slane %v617_v4, 3  ;;  %v168_v6 = vperm.slane %v617_v4, 1  ;;  %v172_v8 = vperm.slane %v617_v4, 5  ;;  %v171_v9 = vperm.slane %v617_v4, 4  ;;  %v258_v22 = vld [vmem:[%s745_s1 + $0x20] sm:$0xff]  ;;  %v257_v24 = vld [vmem:[%s745_s1 + $0x18] sm:$0xff] }
  0x19   : > { %v169_v10 = vperm.slane %v617_v4, 2  ;;  %v173_v11 = vperm.slane %v617_v4, 6  ;;  %v174_v12 = vperm.slane %v617_v4, 7  ;;  %315 = vmatpush.msra.mxu1 %v276_v19  ;;  %v274_v23 = vld [vmem:[%s745_s1 + $0xa0] sm:$0xff]  ;;  %v273_v25 = vld [vmem:[%s745_s1 + $0x98] sm:$0xff]  ;;  %v256_v26 = vld [vmem:[%s745_s1 + $0x10] sm:$0xff] }
  0x1a   : > { %289 = vmatpush.msra.mxu0 %v266_v3  ;;  %179 = vrot.lane.b32.xlu1 %v170_v5, %s530_s17  ;;  %v272_v27 = vld [vmem:[%s745_s1 + $0x90] sm:$0xff]  ;;  %v255_v28 = vld [vmem:[%s745_s1 + $0x8] sm:$0xff]  ;;  %v254_v30 = vld [vmem:[%s745_s1] sm:$0xff]  ;;  %v200_v36 = vperm.slane %v617_v4, 0  ;;  %s351_s7 = sshll.u32 %s161_s6, 4  ;;  %s482_s16 = scalar_lea.hbm %s481_s10, 8  ;;  %s352_s7 = int_to_ptr.vmem [resolvable:$true] %s351_s7 }
  0x1b   : > { %175 = vrot.lane.b32.xlu0 %v168_v6, %s530_s17  ;;  %183 = vrot.lane.b32.xlu2 %v172_v8, %s530_s17  ;;  %v271_v29 = vld [vmem:[%s745_s1 + $0x88] sm:$0xff]  ;;  %v270_v31 = vld [vmem:[%s745_s1 + $0x80] sm:$0xff]  ;;  %p483_p11 = scmp.ne.s32.totalorder %s481_s10, %s482_s16  ;;  %p488_p1 = scmp.lt.s32.totalorder %s486_s19, %s482_s16 }
  0x1c   : > { %290 = vmatpush.msra.mxu0 %v265_v7  ;;  %316 = vmatpush.msra.mxu1 %v275_v21 }
  0x1d   : > { %p484_p12 = pnand %p483_p11, %p590_p5  ;;  %p489_p2 = por %p488_p1, %p487_p0 }
  0x1e   : > { %291 = vmatpush.msra.mxu0 %v264_v13  ;;  %317 = vmatpush.msra.mxu1 %v274_v23 }
  0x1f   : > { %p485_p13 = pneg %p484_p12 }
  0x20   : > { %292 = vmatpush.msra.mxu0 %v263_v14  ;;  %318 = vmatpush.msra.mxu1 %v273_v25 }
  0x21   : > { %p490_p3 = pnand %p489_p2, %p485_p13 }
  0x22   : > { %181 = vrot.lane.b32.xlu1 %v171_v9, %s530_s17  ;;  %293 = vmatpush.msra.mxu0 %v262_v15 }
  0x23   : > { %177 = vrot.lane.b32.xlu0 %v169_v10, %s530_s17  ;;  %185 = vrot.lane.b32.xlu2 %v173_v11, %s530_s17 }
  0x24   : > { %294 = vmatpush.msra.mxu0 %v261_v16  ;;  %319 = vmatpush.msra.mxu1 %v272_v27 }
  0x26   : > { %295 = vmatpush.msra.mxu0 %v260_v18  ;;  %320 = vmatpush.msra.mxu1 %v271_v29  ;;  %v327_v18 = vshrl.u32 %v326_v17, 7 }
  0x28   : > { %296 = vmatpush.msra.mxu0 %v259_v20  ;;  %321 = vmatpush.msra.mxu1 %v270_v31  ;;  %vm328_vm9 = vcmp.eq.s32.totalorder %v327_v18, 0 }
  0x2a   : > { %297 = vmatpush.msra.mxu0 %v258_v22 }
  0x2b   : > { %187 = vrot.lane.b32.xlu0 %v174_v12, %s530_s17  ;;  %v465_v12 = vld [vmem:[%s746_s2] ss:$0 sm:$0xff] }
  0x2c   : > { %298 = vmatpush.msra.mxu0 %v257_v24 }
  0x2e   : > { %299 = vmatpush.msra.mxu0 %v256_v26 }
  0x30   : > { %300 = vmatpush.msra.mxu0 %v255_v28 }
  0x32   : > { %301 = vmatpush.msra.mxu0 %v254_v30 }
  0x75   : > { %v184_v32 = vpop.permute.xlu2 %183 }
  0x7d   : > { %v186_v40 = vpop.permute.xlu2 %185 }
  0x7e   : > { %v194_v50 = vsel %vm189_vm0, %v184_v32, %v186_v40 }
  0x7f   : > { %v221_v0 = vrot.slane %v194_v50, 3  ;;  %v224_v1 = vrot.slane %v194_v50, 2 }
  0x8c   : > { %v180_v33 = vpop.permute.xlu1 %179 }
  0x8d   : > { %v176_v34 = vpop.permute.xlu0 %175 }
  0x8e   : > { %v198_v35 = vsel %vm189_vm0, 0.0, %v176_v34 }
  0x8f   : > { %v204_v37 = vrot.slane %v198_v35, 7 }
  0x91   : > { %v234_v49 = vsel %vm233_vm1, %v200_v36, %v204_v37 }
  0x94   : > { %v182_v38 = vpop.permute.xlu1 %181 }
  0x95   : > { %v178_v39 = vpop.permute.xlu0 %177  ;;  %v192_v43 = vsel %vm189_vm0, %v180_v33, %v182_v38  ;;  %v193_v44 = vsel %vm189_vm0, %v182_v38, %v184_v32 }
  0x96   : > { %v190_v41 = vsel %vm189_vm0, %v176_v34, %v178_v39  ;;  %v191_v42 = vsel %vm189_vm0, %v178_v39, %v180_v33  ;;  %v213_v51 = vrot.slane %v192_v43, 5  ;;  %v216_v52 = vrot.slane %v192_v43, 4 }
  0x97   : > { %v205_v45 = vrot.slane %v190_v41, 7  ;;  %v208_v46 = vrot.slane %v190_v41, 6  ;;  %v209_v47 = vrot.slane %v191_v42, 6  ;;  %v212_v48 = vrot.slane %v191_v42, 5 }
  0x98   : > { %v217_v55 = vrot.slane %v193_v44, 4  ;;  %v220_v56 = vrot.slane %v193_v44, 3 }
  0x99   : > { %v235_v53 = vsel %vm233_vm1, %v168_v6, %v205_v45  ;;  %v237_v54 = vsel %vm236_vm2, %v234_v49, %v208_v46 }
  0x9a   : > { %v238_v57 = vsel %vm236_vm2, %v235_v53, %v209_v47  ;;  %v240_v58 = vsel %vm239_vm3, %v237_v54, %v212_v48 }
  0x9b   : > { %v241_v59 = vsel %vm239_vm3, %v238_v57, %v213_v51  ;;  %v243_v60 = vsel %vm242_vm4, %v240_v58, %v216_v52 }
  0x9c   : > { %v246_v62 = vsel %vm245_vm5, %v243_v60, %v220_v56  ;;  %v244_v63 = vsel %vm242_vm4, %v241_v59, %v217_v55 }
  0x9d   : > { %v188_v61 = vpop.permute.xlu0 %187  ;;  %v249_v7 = vsel %vm248_vm6, %v246_v62, %v224_v1  ;;  %v247_v8 = vsel %vm245_vm5, %v244_v63, %v221_v0 }
  0x9e   : > { %v195_v2 = vsel %vm189_vm0, %v186_v40, %v188_v61  ;;  %v199_v3 = vsel %vm189_vm0, %v188_v61, 0.0 }
  0x9f   : > { %v225_v4 = vrot.slane %v195_v2, 2  ;;  %v229_v5 = vrot.slane %v195_v2, 1  ;;  %v230_v6 = vrot.slane %v199_v3, 1 }
  0xa1   : > { %v252_v9 = vsel %vm251_vm7, %v249_v7, %v229_v5  ;;  %v250_v10 = vsel %vm248_vm6, %v247_v8, %v225_v4 }
  0xa2   : > { %302 = vmatmul.f32.vlgmr.msra.gmra.mxu0 %v252_v9  ;;  %v253_v11 = vsel %vm251_vm7, %v250_v10, %v230_v6 }
  0xa3   : > { %419 = vmatmul.msk.f32.vlgmr.msra.gmra.mxu1 %vm282_vm8, %v253_v11 }
 0x11f   : > { %v303_v13 = vpop.f32.mrf.mxu0 }
 0x120   : > { %v304_v14 = vadd.f32 %v465_v12, %v303_v13  ;;  %v323_v15 = vpop.f32.mrf.mxu1 }
 0x122   : > { %v324_v16 = vadd.f32 %v323_v15, %v304_v14 }
 0x124   : > { %332 = vrot.lane.b32.xlu1 %v324_v16, %s531_s26 }
 0x196   : > { %v333_v19 = vpop.permute.xlu1 %332 }
 0x197   : > { %v335_v20 = vsel %vm328_vm9, %v324_v16, %v333_v19 }
 0x198   : > { %337 = vst.msk [vmem:[%s161_s6] sm:$0xff] %vm336_vm10, %v335_v20 }
 0x199   : > { %493 = shalt.err (!%p490_p3)
}
 0x19a   : > { %424 = dma.vmem_to_hbm [thread:$0]  (%p590_p5), %s352_s7, 128, %s354_s8, %s339_s9  }
 0x19b PF: > { %p430_p4 = scmp.ge.s32.totalorder %s528_s15, 2  ;;  %s365_s25 = sand.u32 1, %s516_s12  }
 0x19c   : > { %s366_s26 = scalar_lea.sflag [#allocation3], %s365_s25 }
 0x19d   : > { %p427_p7 = pnand %p430_p4, %p594_p6 }
 0x19f   : > { %p428_p8 = pneg %p427_p7 }
 0x1a1   : > { %511 = dma.done.wait (%p428_p8), %s366_s26, 128  }
 0x1a2   : > { %513 = vsyncadd (%p428_p8), %s366_s26, 4294967168  ;;  %p13_p9 = scmp.ge.s32.totalorder %s577_s18, 4   ;;  %s750_s12 = smov %s520_s13 }
 0x1a3   : > { %s751_s13 = smov %s524_s14  ;;  %s752_s14 = smov %s588_s21 }
 0x1a4   : > { %s753_s15 = smov %s577_s18  ;;  %15 = sbr.rel (!%p13_p9) target bundleno = 3 (0x3), region = 67 }
 0x1a9   :  { %372 = vsyncpa [#allocation3], 1 }
 0x1aa   :  { %374 = vsyncpa [#allocation3 + $0x1], 1 }

</bundles_post_ra>
